<compile_context>
chip_gen: v7x
topology: tpu7x:2x2x1
jax: 0.10.0
libtpu: 0.0.40
codegen_flags: <defaults>
</compile_context>

<pallas_src>
import functools

import jax
import jax.numpy as jnp
from jax.experimental import pallas as pl
from jax.experimental.pallas import tpu as pltpu


def _gce_kernel(x_ref, t_ref, o_ref, *, q):
    # x_ref: (TN, C) logits tile (native dtype), t_ref: (TN, 1) int32 targets,
    # o_ref: (TN, 1) float32 loss
    x = x_ref[...].astype(jnp.float32)                       # (TN, C)
    t = t_ref[...]                                           # (TN, 1) int32

    # numerically stable log-softmax pieces over the class (lane) axis
    m = jnp.max(x, axis=1, keepdims=True)                    # (TN, 1)  XLU
    z = x - m                                                # (TN, C)  VPU
    logsumexp = jnp.log(jnp.sum(jnp.exp(z), axis=1, keepdims=True))  # EUP+XLU

    # target logit via masked lane-reduction (no full log_probs intermediate)
    cls = jax.lax.broadcasted_iota(jnp.int32, x.shape, 1)    # (TN, C)
    z_t = jnp.sum(jnp.where(cls == t, z, 0.0), axis=1, keepdims=True)  # (TN, 1)

    tgt_logp = z_t - logsumexp                               # (TN, 1) = log p_t
    ce = -tgt_logp                                           # (TN, 1)
    # targets_prob ** q == exp(q * log(targets_prob)) == exp(q * tgt_logp)
    weight = jnp.exp(q * tgt_logp)                           # (TN, 1)
    o_ref[...] = (ce * weight).astype(o_ref.dtype)


def _round_up(x, m):
    return ((x + m - 1) // m) * m


def generalized_ce_loss(logits, targets, q=0.7, block_n=None,
                        vmem_limit_bytes=48 * 1024 * 1024):
    """logits: (N, C) float (any dtype), targets: (N,) int -> (N,) float32."""
    n, c = logits.shape
    in_bytes = jnp.dtype(logits.dtype).itemsize

    if block_n is None:
        # ~24 MiB budget for the double-buffered native-dtype input block plus
        # f32 in-kernel intermediates (~12 B/elem, conservative).
        budget = 24 * 1024 * 1024
        per_elem = 2 * in_bytes + 12
        rows = budget // max(1, c * per_elem)
        block_n = max(8, min(2048, (rows // 8) * 8))
    # keep at least 2 grid blocks when possible (v7x: shard across both TCs)
    if n > 8:
        block_n = min(block_n, _round_up(pl.cdiv(n, 2), 8))
    block_n = max(8, min(block_n, _round_up(n, 8)))

    t = targets.astype(jnp.int32).reshape(n, 1)
    grid = pl.cdiv(n, block_n)

    cost = pl.CostEstimate(
        flops=6 * n * c,
        transcendentals=n * (c + 2),
        bytes_accessed=n * c * in_bytes + n * 4 + n * 4,
    )

    out = pl.pallas_call(
        functools.partial(_gce_kernel, q=q),
        out_shape=jax.ShapeDtypeStruct((n, 1), jnp.float32),
        grid_spec=pltpu.PrefetchScalarGridSpec(
            num_scalar_prefetch=0,
            grid=(grid,),
            in_specs=[
                pl.BlockSpec((block_n, c), lambda i: (i, 0)),
                pl.BlockSpec((block_n, 1), lambda i: (i, 0)),
            ],
            out_specs=pl.BlockSpec((block_n, 1), lambda i: (i, 0)),
        ),
        compiler_params=pltpu.CompilerParams(
            dimension_semantics=("parallel",),
            vmem_limit_bytes=vmem_limit_bytes,
        ),
        cost_estimate=cost,
    )(logits, t)

    return out[:, 0]


def _reference(logits, targets, q=0.7):
    logits = logits.astype(jnp.float32)
    logp = jax.nn.log_softmax(logits, axis=1)
    tgt_logp = jnp.take_along_axis(
        logp, targets[:, None].astype(jnp.int32), axis=1)[:, 0]
    return -tgt_logp * jnp.exp(q * tgt_logp)


if __name__ == "__main__":
    key = jax.random.PRNGKey(0)
    k1, k2, k3, k4 = jax.random.split(key, 4)

    # primary check: batch=8, num_classes=32, f32 logits
    N, C = 8, 32
    logits = jax.random.normal(k1, (N, C), dtype=jnp.float32)
    targets = jax.random.randint(k2, (N,), 0, C, dtype=jnp.int32)

    out = jax.block_until_ready(generalized_ce_loss(logits, targets, q=0.7))
    ref = _reference(logits, targets, q=0.7)
    assert out.shape == (N,)
    assert jnp.allclose(out, ref, atol=1e-5, rtol=1e-5), (out, ref)

    # secondary check: ragged batch (N=13) + bf16 logits — exercises the
    # no-pad boundary-block path and the native-dtype streaming path.
    N2, C2 = 13, 40
    logits2 = jax.random.normal(k3, (N2, C2), dtype=jnp.float32).astype(jnp.bfloat16)
    targets2 = jax.random.randint(k4, (N2,), 0, C2, dtype=jnp.int32)

    out2 = jax.block_until_ready(generalized_ce_loss(logits2, targets2, q=0.7))
    ref2 = _reference(logits2, targets2, q=0.7)
    assert out2.shape == (N2,)
    assert jnp.allclose(out2, ref2, atol=1e-4, rtol=1e-4), (out2, ref2)

    print("KERNEL_OK")
</pallas_src>

<mosaic_0001>
module attributes {stable_mosaic.version = 11 : i64} {
  func.func @_gce_kernel(%arg0: i32, %arg1: memref<8x32xf32, #tpu.memory_space<vmem>>, %arg2: memref<8x1xi32, #tpu.memory_space<vmem>>, %arg3: memref<8x1xf32, #tpu.memory_space<vmem>>) attributes {dimension_semantics = [#tpu.dimension_semantics<parallel>], iteration_bounds = array<i64: 1>, scalar_prefetch = 0 : i64, scratch_operands = 0 : i64, tpu.core_type = #tpu.core_type<tc>, window_params = [{transform_indices = @transform_0, window_bounds = array<i64: 8, 32>}, {transform_indices = @transform_1, window_bounds = array<i64: 8, 1>}, {transform_indices = @transform_2, window_bounds = array<i64: 8, 1>}]} {
    %c0 = arith.constant 0 : index
    %c0_0 = arith.constant 0 : index
    %0 = vector.load %arg1[%c0, %c0_0] : memref<8x32xf32, #tpu.memory_space<vmem>>, vector<8x32xf32>
    %c0_1 = arith.constant 0 : index
    %c0_2 = arith.constant 0 : index
    %1 = vector.load %arg2[%c0_1, %c0_2] : memref<8x1xi32, #tpu.memory_space<vmem>>, vector<8x1xi32>
    %cst = arith.constant dense<0xFF800000> : vector<8xf32>
    %2 = vector.multi_reduction <maximumf>, %0, %cst [1] : vector<8x32xf32> to vector<8xf32>
    %3 = vector.shape_cast %2 : vector<8xf32> to vector<8x1xf32>
    %4 = vector.broadcast %3 : vector<8x1xf32> to vector<8x32xf32>
    %5 = arith.subf %0, %4 : vector<8x32xf32>
    %6 = math.exp %5 : vector<8x32xf32>
    %cst_3 = arith.constant dense<0.000000e+00> : vector<8xf32>
    %7 = vector.multi_reduction <add>, %6, %cst_3 [1] : vector<8x32xf32> to vector<8xf32>
    %8 = vector.shape_cast %7 : vector<8xf32> to vector<8x1xf32>
    %9 = math.log %8 : vector<8x1xf32>
    %10 = tpu.iota {dimensions = array<i32: 1>} : vector<8x32xi32>
    %11 = vector.broadcast %1 : vector<8x1xi32> to vector<8x32xi32>
    %12 = arith.cmpi eq, %10, %11 : vector<8x32xi32>
    %cst_4 = arith.constant 0.000000e+00 : f32
    %13 = vector.broadcast %cst_4 : f32 to vector<8x32xf32>
    %14 = arith.select %12, %5, %13 : vector<8x32xi1>, vector<8x32xf32>
    %cst_5 = arith.constant dense<0.000000e+00> : vector<8xf32>
    %15 = vector.multi_reduction <add>, %14, %cst_5 [1] : vector<8x32xf32> to vector<8xf32>
    %16 = vector.shape_cast %15 : vector<8xf32> to vector<8x1xf32>
    %17 = arith.subf %16, %9 : vector<8x1xf32>
    %cst_6 = arith.constant 0.000000e+00 : f32
    %18 = vector.broadcast %cst_6 : f32 to vector<8x1xf32>
    %19 = arith.subf %18, %17 : vector<8x1xf32>
    %cst_7 = arith.constant 0.699999988 : f32
    %20 = vector.broadcast %cst_7 : f32 to vector<8x1xf32>
    %21 = arith.mulf %20, %17 : vector<8x1xf32>
    %22 = math.exp %21 : vector<8x1xf32>
    %23 = arith.mulf %19, %22 : vector<8x1xf32>
    %c0_8 = arith.constant 0 : index
    %c0_9 = arith.constant 0 : index
    %24 = vector.load %arg3[%c0_8, %c0_9] : memref<8x1xf32, #tpu.memory_space<vmem>>, vector<8x1xf32>
    tpu.vector_store %arg3[%c0_8, %c0_9], %23 {strides = array<i32>} : memref<8x1xf32, #tpu.memory_space<vmem>>, vector<8x1xf32>,
    return
  }
  func.func @transform_0(%arg0: i32) -> (i32, i32) {
    %c0_i32 = arith.constant 0 : i32
    %c0_i32_0 = arith.constant 0 : i32
    return %arg0, %c0_i32 : i32, i32
  }
  func.func @transform_1(%arg0: i32) -> (i32, i32) {
    %c0_i32 = arith.constant 0 : i32
    %c0_i32_0 = arith.constant 0 : i32
    return %arg0, %c0_i32 : i32, i32
  }
  func.func @transform_2(%arg0: i32) -> (i32, i32) {
    %c0_i32 = arith.constant 0 : i32
    %c0_i32_0 = arith.constant 0 : i32
    return %arg0, %c0_i32 : i32, i32
  }
}

</mosaic_0001>

<bundles_post_ra>
// kernel: tpu_custom_call.1
= control target key start
LH: loop header
LB: loop body
LE: loop exit
PB: predicated region body
PF: predicated region fallthrough
CT: control target
= control target key end

     0   :  { %vm13_vm0 = vcmask 261120   ;;  %v55_v1 = vmov 0   ;;  %v25_v7 = vlaneseq  ;;  %vm41_vm2 = vcmask 7168   ;;  %s83_s0 = inlined_call_operand.vmem [shape: f32[8,32], index: 0, kind: input, shape index: {}]   ;;  %s84_s1 = inlined_call_operand.vmem [shape: s32[8,1], index: 1, kind: input, shape index: {}]   ;;  %s85_s2 = inlined_call_operand.vmem [shape: f32[8,1], index: 2, kind: output, shape index: {}]  }
   0x1   :  { %v11_v0 = vld [vmem:[%s83_s0] sm:$0xff]  ;;  %48 = vset.pattern.permute.xlu0 %v55_v1 }
   0x2   :  { %v14_v2 = vsel %vm13_vm0, %v11_v0, -inf  ;;  %v12_v3 = vld [vmem:[%s84_s1] sm:$0xff]  ;;  %v26_v8 = vand.u32 127, %v25_v7 }
   0x3   :  { %15 = vmax.xlane.f32.xlu0 %v14_v2 }
  0x19   :  { %28 = vperm.xlu0 %48, %v12_v3  }
  0x90   :  { %v16_v4 = vpop.xlane.xlu0 %15 }
  0x91   :  { %v17_v5 = vsub.f32 %v11_v0, %v16_v4 }
  0x93   :  { %v18_v6 = vmul.f32 1.442695, %v17_v5 }
  0x95   :  { %49 = vpow2.f32 %v18_v6 }
  0x98   :  { %v29_v9 = vpop.permute.xlu0 %28 }
  0x99   :  { %vm30_vm1 = vcmp.eq.s32.totalorder %v26_v8, %v29_v9 }
  0x9a   :  { %v31_v12 = vsel %vm30_vm1, %v17_v5, 0.0 }
  0x9b   :  { %v32_v13 = vsel %vm13_vm0, %v31_v12, 0.0 }
  0x9f   :  { %v50_v10 = vpop.eup %49 }
  0xa0   :  { %v20_v11 = vsel %vm13_vm0, %v50_v10, 0.0 }
  0xa1   :  { %21 = vadd.xlane.f32.xlu1 %v20_v11 }
  0xa5   :  { %33 = vadd.xlane.f32.xlu1 %v32_v13 }
 0x12e   :  { %v22_v14 = vpop.xlane.xlu1 %21 }
 0x12f   :  { %51 = vlog2.f32 %v22_v14 }
 0x132   :  { %v34_v17 = vpop.xlane.xlu1 %33 }
 0x139   :  { %v52_v15 = vpop.eup %51 }
 0x13a   :  { %v24_v16 = vmul.f32 0.6931472, %v52_v15 }
 0x13c   :  { %v35_v18 = vsub.f32 %v34_v17, %v24_v16 }
 0x13e   :  { %v37_v19 = vmul.f32 0.7, %v35_v18  ;;  %v36_v21 = vsub.f32 0.0, %v35_v18 }
 0x140   :  { %v38_v20 = vmul.f32 1.442695, %v37_v19 }
 0x142   :  { %53 = vpow2.f32 %v38_v20 }
 0x14c   :  { %v54_v22 = vpop.eup %53 }
 0x14d   :  { %v40_v23 = vmul.f32 %v54_v22, %v36_v21 }
 0x14f   :  { %42 = vst.msk [vmem:[%s85_s2] sm:$0xff] %vm41_vm2, %v40_v23 }

</bundles_post_ra>
